<compile_context>
chip_gen: v5e
topology: v5e:2x2
jax: 0.10.0
libtpu: 0.0.40
codegen_flags: <defaults>
</compile_context>

<pallas_src>
import functools

import jax
import jax.numpy as jnp
from jax.experimental import pallas as pl
from jax.experimental.pallas import tpu as pltpu

H1 = 256  # hidden 1
H2 = 128  # hidden 2


def _mlp_kernel(x_ref, w1_ref, b1_ref, w2_ref, b2_ref, w3_ref, b3_ref, o_ref):
    # Full 3-layer MLP for one batch tile; all operands resident in VMEM.
    # Matmuls run in bf16 on the MXU with f32 accumulation; bias/ReLU stay f32
    # (correct & required on v5e, fine on v6e/v7x).
    x = x_ref[...].astype(jnp.bfloat16)                                 # [tb, D]

    h1 = jnp.dot(x, w1_ref[...], preferred_element_type=jnp.float32)   # [tb, H1]
    h1 = jnp.maximum(h1 + b1_ref[...], 0.0)

    h2 = jnp.dot(h1.astype(jnp.bfloat16), w2_ref[...],
                 preferred_element_type=jnp.float32)                    # [tb, H2]
    h2 = jnp.maximum(h2 + b2_ref[...], 0.0)

    # Final 128 -> 1 layer: f32 VPU multiply + lane (XLU) reduce; keeps the MXU
    # out of a 1-useful-column matmul and the output lane-narrow.
    score = jnp.sum(h2 * w3_ref[...], axis=-1, keepdims=True) + b3_ref[...]
    o_ref[...] = score.astype(o_ref.dtype)                              # [tb, 1]


def _round_up(x, m):
    return ((x + m - 1) // m) * m


def _choose_tb(B, D):
    """Pick the batch tile: big enough to amortize ~0.35 us/step pipeline
    overhead, small enough to keep >=2 grid steps for v7x's two TensorCores."""
    cap = 2048 if D <= 512 else 1024          # per-tile f32 x stays well < scoped VMEM
    tb = min(cap, _round_up(B, 8))
    # Guarantee >= 2 grid steps when the batch allows it (v7x megacore sharding;
    # harmless no-op effect on single-TC v5e/v6e).
    tb = min(tb, max(8, _round_up(pl.cdiv(B, 2), 128)))
    return max(tb, 8)


def prepare_discriminator_params(params):
    """One-time per-training-run prep: bf16 weights for the MXU, f32 biases,
    final layer kept in f32 as a lane row-vector + scalar."""
    w1, b1, w2, b2, w3, b3 = params
    return (
        w1.astype(jnp.bfloat16),            # [D, H1]
        b1.astype(jnp.float32),             # [1, H1]
        w2.astype(jnp.bfloat16),            # [H1, H2]
        b2.astype(jnp.float32),             # [1, H2]
        w3.reshape(1, H2).astype(jnp.float32),  # [1, H2] row vector (f32)
        b3.reshape(1, 1).astype(jnp.float32),   # [1, 1]
    )


@functools.partial(jax.jit, static_argnames=("tb",))
def discriminator_forward(x, prepared_params, *, tb=None):
    """x: [B, D] float32 -> [B, 1] float32 critic scores."""
    w1, b1, w2, b2, w3_row, b3 = prepared_params
    B, D = x.shape
    if tb is None:
        tb = _choose_tb(B, D)
    grid = pl.cdiv(B, tb)

    flops = 2 * B * (D * H1 + H1 * H2 + H2)
    bytes_accessed = (
        B * D * 4                                   # x (f32, read once)
        + (D * H1 + H1 * H2) * 2                    # bf16 weights (fetched once)
        + (H1 + H2 + H2 + 1) * 4                    # f32 biases + final row
        + B * 4                                     # 1-column f32 output
    )

    out = pl.pallas_call(
        _mlp_kernel,
        out_shape=jax.ShapeDtypeStruct((B, 1), jnp.float32),
        grid_spec=pltpu.PrefetchScalarGridSpec(
            num_scalar_prefetch=0,
            grid=(grid,),
            in_specs=[
                pl.BlockSpec((tb, D), lambda i: (i, 0)),    # x tile (streamed, f32)
                # Constant-index blocks: DMA'd once, resident across the grid.
                pl.BlockSpec((D, H1), lambda i: (0, 0)),    # W1 (bf16)
                pl.BlockSpec((1, H1), lambda i: (0, 0)),    # b1 (f32)
                pl.BlockSpec((H1, H2), lambda i: (0, 0)),   # W2 (bf16)
                pl.BlockSpec((1, H2), lambda i: (0, 0)),    # b2 (f32)
                pl.BlockSpec((1, H2), lambda i: (0, 0)),    # W3 row (f32)
                pl.BlockSpec((1, 1), lambda i: (0, 0)),     # b3 scalar (f32)
            ],
            out_specs=pl.BlockSpec((tb, 1), lambda i: (i, 0)),   # single real column
        ),
        compiler_params=pltpu.CompilerParams(
            dimension_semantics=("parallel",),
        ),
        cost_estimate=pl.CostEstimate(
            flops=flops, transcendentals=0, bytes_accessed=bytes_accessed
        ),
    )(x, w1, b1, w2, b2, w3_row, b3)

    return out


def init_discriminator_params(key, input_dim):
    """Deterministic init matching PyTorch nn.Linear default (U[-1/sqrt(fan_in), ...])."""
    dims = [(input_dim, H1), (H1, H2), (H2, 1)]
    params = []
    for (fan_in, fan_out) in dims:
        key, kw, kb = jax.random.split(key, 3)
        bound = 1.0 / jnp.sqrt(fan_in)
        w = jax.random.uniform(kw, (fan_in, fan_out), jnp.float32, -bound, bound)
        b = jax.random.uniform(kb, (1, fan_out), jnp.float32, -bound, bound)
        params += [w, b]
    return tuple(params)


def _reference_forward_bf16(x, params):
    # Pure-JAX reference with the same bf16-matmul / f32-accumulate / f32-final recipe.
    w1, b1, w2, b2, w3, b3 = params
    xb = x.astype(jnp.bfloat16)
    h1 = jnp.maximum(
        jnp.dot(xb, w1.astype(jnp.bfloat16), preferred_element_type=jnp.float32) + b1, 0.0)
    h2 = jnp.maximum(
        jnp.dot(h1.astype(jnp.bfloat16), w2.astype(jnp.bfloat16),
                preferred_element_type=jnp.float32) + b2, 0.0)
    return jnp.sum(h2 * w3.reshape(1, H2), axis=-1, keepdims=True) + b3.reshape(1, 1)


def _reference_forward_f32(x, params):
    w1, b1, w2, b2, w3, b3 = params
    h1 = jnp.maximum(x @ w1 + b1, 0.0)
    h2 = jnp.maximum(h1 @ w2 + b2, 0.0)
    return h2 @ w3 + b3


if __name__ == "__main__":
    key = jax.random.PRNGKey(0)
    k_params, k_x1, k_x2 = jax.random.split(key, 3)

    input_dim = 32
    params = init_discriminator_params(k_params, input_dim)
    prepared = prepare_discriminator_params(params)   # one-time prep (hoisted out of forward)

    # Case 1: small batch (single tile, block == full array).
    x1 = jax.random.normal(k_x1, (8, input_dim), jnp.float32)
    out1 = jax.block_until_ready(discriminator_forward(x1, prepared))
    assert out1.shape == (8, 1), out1.shape
    assert jnp.allclose(out1, _reference_forward_bf16(x1, params), atol=1e-3, rtol=1e-3)
    assert jnp.allclose(out1, _reference_forward_f32(x1, params), atol=5e-2, rtol=5e-2)

    # Case 2: ragged batch (multi-step grid, partial last block handled by Pallas).
    x2 = jax.random.normal(k_x2, (300, input_dim), jnp.float32)
    out2 = jax.block_until_ready(discriminator_forward(x2, prepared))
    assert out2.shape == (300, 1), out2.shape
    assert jnp.allclose(out2, _reference_forward_bf16(x2, params), atol=1e-3, rtol=1e-3)
    assert jnp.allclose(out2, _reference_forward_f32(x2, params), atol=5e-2, rtol=5e-2)

    print("KERNEL_OK")
</pallas_src>

<mosaic_0001>
module attributes {stable_mosaic.version = 11 : i64} {
  func.func @_mlp_kernel(%arg0: i32, %arg1: memref<8x32xf32, #tpu.memory_space<vmem>>, %arg2: memref<32x256xbf16, #tpu.memory_space<vmem>>, %arg3: memref<1x256xf32, #tpu.memory_space<vmem>>, %arg4: memref<256x128xbf16, #tpu.memory_space<vmem>>, %arg5: memref<1x128xf32, #tpu.memory_space<vmem>>, %arg6: memref<1x128xf32, #tpu.memory_space<vmem>>, %arg7: memref<1x1xf32, #tpu.memory_space<vmem>>, %arg8: memref<8x1xf32, #tpu.memory_space<vmem>>) attributes {dimension_semantics = [#tpu.dimension_semantics<parallel>], iteration_bounds = array<i64: 1>, scalar_prefetch = 0 : i64, scratch_operands = 0 : i64, tpu.core_type = #tpu.core_type<tc>, window_params = [{transform_indices = @transform_0, window_bounds = array<i64: 8, 32>}, {pipeline_mode = #tpu.pipeline_mode<synchronous>, transform_indices = @transform_1, window_bounds = array<i64: 32, 256>}, {pipeline_mode = #tpu.pipeline_mode<synchronous>, transform_indices = @transform_2, window_bounds = array<i64: 1, 256>}, {pipeline_mode = #tpu.pipeline_mode<synchronous>, transform_indices = @transform_3, window_bounds = array<i64: 256, 128>}, {pipeline_mode = #tpu.pipeline_mode<synchronous>, transform_indices = @transform_4, window_bounds = array<i64: 1, 128>}, {pipeline_mode = #tpu.pipeline_mode<synchronous>, transform_indices = @transform_5, window_bounds = array<i64: 1, 128>}, {pipeline_mode = #tpu.pipeline_mode<synchronous>, transform_indices = @transform_6, window_bounds = array<i64: 1, 1>}, {transform_indices = @transform_7, window_bounds = array<i64: 8, 1>}]} {
    %c0 = arith.constant 0 : index
    %c0_0 = arith.constant 0 : index
    %0 = vector.load %arg1[%c0, %c0_0] : memref<8x32xf32, #tpu.memory_space<vmem>>, vector<8x32xf32>
    %1 = arith.truncf %0 : vector<8x32xf32> to vector<8x32xbf16>
    %c0_1 = arith.constant 0 : index
    %c0_2 = arith.constant 0 : index
    %2 = vector.load %arg2[%c0_1, %c0_2] : memref<32x256xbf16, #tpu.memory_space<vmem>>, vector<32x256xbf16>
    %cst = arith.constant dense<0.000000e+00> : vector<8x256xf32>
    %3 = tpu.matmul %1, %2, %cst {dimension_numbers = #tpu.dot_dimension_numbers<[1], [0], [0], [1], [0, 0, 1, 1], [], []>} : vector<8x32xbf16>, vector<32x256xbf16>, vector<8x256xf32> -> vector<8x256xf32>
    %c0_3 = arith.constant 0 : index
    %c0_4 = arith.constant 0 : index
    %4 = vector.load %arg3[%c0_3, %c0_4] : memref<1x256xf32, #tpu.memory_space<vmem>>, vector<1x256xf32>
    %5 = vector.broadcast %4 : vector<1x256xf32> to vector<8x256xf32>
    %6 = arith.addf %3, %5 : vector<8x256xf32>
    %cst_5 = arith.constant 0.000000e+00 : f32
    %7 = vector.broadcast %cst_5 : f32 to vector<8x256xf32>
    %8 = arith.maximumf %6, %7 : vector<8x256xf32>
    %9 = arith.truncf %8 : vector<8x256xf32> to vector<8x256xbf16>
    %c0_6 = arith.constant 0 : index
    %c0_7 = arith.constant 0 : index
    %10 = vector.load %arg4[%c0_6, %c0_7] : memref<256x128xbf16, #tpu.memory_space<vmem>>, vector<256x128xbf16>
    %cst_8 = arith.constant dense<0.000000e+00> : vector<8x128xf32>
    %11 = tpu.matmul %9, %10, %cst_8 {dimension_numbers = #tpu.dot_dimension_numbers<[1], [0], [0], [1], [0, 0, 1, 1], [], []>} : vector<8x256xbf16>, vector<256x128xbf16>, vector<8x128xf32> -> vector<8x128xf32>
    %c0_9 = arith.constant 0 : index
    %c0_10 = arith.constant 0 : index
    %12 = vector.load %arg5[%c0_9, %c0_10] : memref<1x128xf32, #tpu.memory_space<vmem>>, vector<1x128xf32>
    %13 = vector.broadcast %12 : vector<1x128xf32> to vector<8x128xf32>
    %14 = arith.addf %11, %13 : vector<8x128xf32>
    %cst_11 = arith.constant 0.000000e+00 : f32
    %15 = vector.broadcast %cst_11 : f32 to vector<8x128xf32>
    %16 = arith.maximumf %14, %15 : vector<8x128xf32>
    %c0_12 = arith.constant 0 : index
    %c0_13 = arith.constant 0 : index
    %17 = vector.load %arg6[%c0_12, %c0_13] : memref<1x128xf32, #tpu.memory_space<vmem>>, vector<1x128xf32>
    %18 = vector.broadcast %17 : vector<1x128xf32> to vector<8x128xf32>
    %19 = arith.mulf %16, %18 : vector<8x128xf32>
    %cst_14 = arith.constant dense<0.000000e+00> : vector<8xf32>
    %20 = vector.multi_reduction <add>, %19, %cst_14 [1] : vector<8x128xf32> to vector<8xf32>
    %21 = vector.shape_cast %20 : vector<8xf32> to vector<8x1xf32>
    %c0_15 = arith.constant 0 : index
    %c0_16 = arith.constant 0 : index
    %22 = vector.load %arg7[%c0_15, %c0_16] : memref<1x1xf32, #tpu.memory_space<vmem>>, vector<1x1xf32>
    %23 = vector.broadcast %22 : vector<1x1xf32> to vector<8x1xf32>
    %24 = arith.addf %21, %23 : vector<8x1xf32>
    %c0_17 = arith.constant 0 : index
    %c0_18 = arith.constant 0 : index
    %25 = vector.load %arg8[%c0_17, %c0_18] : memref<8x1xf32, #tpu.memory_space<vmem>>, vector<8x1xf32>
    tpu.vector_store %arg8[%c0_17, %c0_18], %24 {strides = array<i32>} : memref<8x1xf32, #tpu.memory_space<vmem>>, vector<8x1xf32>,
    return
  }
  func.func @transform_0(%arg0: i32) -> (i32, i32) {
    %c0_i32 = arith.constant 0 : i32
    %c0_i32_0 = arith.constant 0 : i32
    return %arg0, %c0_i32 : i32, i32
  }
  func.func @transform_1(%arg0: i32) -> (i32, i32) {
    %c0_i32 = arith.constant 0 : i32
    %c0_i32_0 = arith.constant 0 : i32
    %c0_i32_1 = arith.constant 0 : i32
    return %c0_i32, %c0_i32_0 : i32, i32
  }
  func.func @transform_2(%arg0: i32) -> (i32, i32) {
    %c0_i32 = arith.constant 0 : i32
    %c0_i32_0 = arith.constant 0 : i32
    %c0_i32_1 = arith.constant 0 : i32
    return %c0_i32, %c0_i32_0 : i32, i32
  }
  func.func @transform_3(%arg0: i32) -> (i32, i32) {
    %c0_i32 = arith.constant 0 : i32
    %c0_i32_0 = arith.constant 0 : i32
    %c0_i32_1 = arith.constant 0 : i32
    return %c0_i32, %c0_i32_0 : i32, i32
  }
  func.func @transform_4(%arg0: i32) -> (i32, i32) {
    %c0_i32 = arith.constant 0 : i32
    %c0_i32_0 = arith.constant 0 : i32
    %c0_i32_1 = arith.constant 0 : i32
    return %c0_i32, %c0_i32_0 : i32, i32
  }
  func.func @transform_5(%arg0: i32) -> (i32, i32) {
    %c0_i32 = arith.constant 0 : i32
    %c0_i32_0 = arith.constant 0 : i32
    %c0_i32_1 = arith.constant 0 : i32
    return %c0_i32, %c0_i32_0 : i32, i32
  }
  func.func @transform_6(%arg0: i32) -> (i32, i32) {
    %c0_i32 = arith.constant 0 : i32
    %c0_i32_0 = arith.constant 0 : i32
    %c0_i32_1 = arith.constant 0 : i32
    return %c0_i32, %c0_i32_0 : i32, i32
  }
  func.func @transform_7(%arg0: i32) -> (i32, i32) {
    %c0_i32 = arith.constant 0 : i32
    %c0_i32_0 = arith.constant 0 : i32
    return %arg0, %c0_i32 : i32, i32
  }
}

</mosaic_0001>

<bundles_post_ra>
// kernel: discriminator_forward.1
= control target key start
LH: loop header
LB: loop body
LE: loop exit
PB: predicated region body
PF: predicated region fallthrough
CT: control target
= control target key end

     0   :  { %s578_s0 = inlined_call_operand.hbm [shape: f32[8,32], index: 0, kind: input, shape index: {}]   ;;  %s579_s1 = inlined_call_operand.hbm [shape: bf16[32,256], index: 1, kind: input, shape index: {}]   ;;  %s580_s2 = inlined_call_operand.vmem [shape: f32[1,256], index: 2, kind: input, shape index: {}]   ;;  %s581_s3 = inlined_call_operand.hbm [shape: bf16[256,128], index: 3, kind: input, shape index: {}]   ;;  %s582_s4 = inlined_call_operand.vmem [shape: f32[1,128], index: 4, kind: input, shape index: {}]   ;;  %s583_s5 = inlined_call_operand.vmem [shape: f32[1,128], index: 5, kind: input, shape index: {}]   ;;  %s584_s6 = inlined_call_operand.<no memory space> [shape: f32[1,1], index: 6, kind: input, shape index: {}]   ;;  %s585_s7 = inlined_call_operand.vmem [shape: f32[8,1], index: 7, kind: output, shape index: {}]  }
   0x1   :  { %v12_v0 = vstv %s584_s6 }
   0x2   :  { %13 = vst [vmem:[#allocation2] sm:$0x1] %v12_v0 }
   0x3   :  { %14 = vsyncpa [#allocation4], 0 }
   0x4   :  { %15 = vsyncpa [#allocation6], 0  ;;  %s31_s28 = sshll.u32 %s579_s1, 4  ;;  %s507_s29 = smov [#allocation5]   ;;  %s32_s28 = int_to_ptr.hbm [resolvable:$true] %s31_s28 }
   0x5   :  { %s33_s30 = sshll.u32 %s507_s29, 4  ;;  %s21_s10 = sshll.u32 %s578_s0, 4  ;;  %s34_s30 = int_to_ptr.vmem [resolvable:$true] %s33_s30  ;;  %s22_s10 = int_to_ptr.hbm [resolvable:$true] %s21_s10 }
   0x6   :  { %s508_s11 = smov 128   ;;  %s509_s12 = smov 8  }
   0x7   :  { %39 = dma.hbm_to_vmem [thread:$0]  %s32_s28, 512, %s34_s30, [#allocation6], %s508_s11, %s508_s11, %s509_s12  }
   0x8   :  { %s510_s6 = smov [#allocation3]   ;;  %s46_s16 = sshll.u32 %s581_s3, 4  ;;  %s47_s16 = int_to_ptr.hbm [resolvable:$true] %s46_s16 }
   0x9   :  { %s23_s13 = sshll.u32 %s510_s6, 4  ;;  %s511_s1 = smov [#allocation7]   ;;  %s24_s13 = int_to_ptr.vmem [resolvable:$true] %s23_s13 }
   0xa   :  { %26 = dma.hbm_to_vmem [thread:$0]  %s22_s10, 128, %s24_s13, [#allocation4]  }
   0xb   :  { %s48_s17 = sshll.u32 %s511_s1, 4  ;;  %s512_s18 = smov 64   ;;  %s49_s17 = int_to_ptr.vmem [resolvable:$true] %s48_s17 }
   0xc   :  { %s513_s19 = smov 4  }
   0xd   :  { %54 = dma.hbm_to_vmem [thread:$0]  %s47_s16, 2048, %s49_s17, [#allocation6], %s512_s18, %s512_s18, %s513_s19  }
   0xe   :  { %503 = dma.done.wait [#allocation4], 128  }
   0xf   :  { %504 = vsyncadd [#allocation4], 4294967168 }
  0x10   :  { %505 = dma.done.wait [#allocation6], 2560  }
  0x11   :  { %506 = vsyncadd [#allocation6], 4294964736  ;;  %v329_v1 = vld [vmem:[#allocation5 + $0x10] sm:$0xf]  ;;  %v404_v2 = vld [vmem:[#allocation5 + $0x14] sm:$0xf0] }
  0x12   :  { %v403_v3 = vld [vmem:[#allocation5 + $0x14] sm:$0xf]  ;;  %v330_v4 = vor.u32 %v404_v2, %v329_v1  ;;  %v331_v5 = vld [vmem:[#allocation5 + $0x18] sm:$0xf0]  ;;  %v321_v6 = vld [vmem:[#allocation5] sm:$0xf] }
  0x13   :  { %v402_v7 = vld [vmem:[#allocation5 + $0x4] sm:$0xf0]  ;;  %v334_v8 = vor.u32 %v403_v3, %v331_v5  ;;  %v401_v9 = vld [vmem:[#allocation5 + $0x4] sm:$0xf]  ;;  %v323_v10 = vld [vmem:[#allocation5 + $0x8] sm:$0xf0] }
  0x14   :  { %116 = vmatpush.bf16.msra.mxu0 %v330_v4  ;;  %v322_v11 = vor.u32 %v402_v7, %v321_v6  ;;  %v74_v12 = vld [vmem:[#allocation3] sm:$0xff]  ;;  %v326_v15 = vor.u32 %v401_v9, %v323_v10  ;;  %v411_v16 = vld [vmem:[#allocation7 + $0x30] sm:$0xff]  ;;  %vm106_vm0 = vcmask 261120   ;;  %v410_v19 = vld [vmem:[#allocation7 + $0x28] sm:$0xff]  ;;  %vm311_vm1 = vcmask 7168  }
  0x15   :  { %v412_v13 = vld [vmem:[#allocation7 + $0x38] sm:$0xff]  ;;  %129 = vmatpush.bf16.msra.mxu1 %v334_v8  ;;  %v419_v17 = vld [vmem:[#allocation7 + $0x70] sm:$0xff]  ;;  %v75_v18 = vpack.c.bf16 %v74_v12, %v74_v12  ;;  %v418_v20 = vld [vmem:[#allocation7 + $0x68] sm:$0xff] }
  0x16   :  { %v420_v14 = vld [vmem:[#allocation7 + $0x78] sm:$0xff]  ;;  %272 = vmatpush.bf16.msra.mxu2 %v412_v13  ;;  %v409_v21 = vld [vmem:[#allocation7 + $0x20] sm:$0xff]  ;;  %v407_v25 = vld [vmem:[#allocation7 + $0x10] sm:$0xff] }
  0x17   :  { %285 = vmatpush.bf16.msra.mxu3 %v420_v14  ;;  %v417_v22 = vld [vmem:[#allocation7 + $0x60] sm:$0xff]  ;;  %v408_v23 = vld [vmem:[#allocation7 + $0x18] sm:$0xff]  ;;  %v415_v26 = vld [vmem:[#allocation7 + $0x50] sm:$0xff] }
  0x18   :  { %117 = vmatpush.bf16.msra.mxu0 %v322_v11  ;;  %v416_v24 = vld [vmem:[#allocation7 + $0x58] sm:$0xff]  ;;  %v406_v27 = vld [vmem:[#allocation7 + $0x8] sm:$0xff]  ;;  %v405_v29 = vld [vmem:[#allocation7] sm:$0xff] }
  0x19   :  { %130 = vmatpush.bf16.msra.mxu1 %v326_v15  ;;  %v414_v28 = vld [vmem:[#allocation7 + $0x48] sm:$0xff]  ;;  %v413_v30 = vld [vmem:[#allocation7 + $0x40] sm:$0xff]  ;;  %v80_v31 = vld [vmem:[%s580_s2] sm:$0x3] }
  0x1a   :  { %273 = vmatpush.bf16.msra.mxu2 %v411_v16  ;;  %v82_v32 = vperm.slane %v80_v31, 0  ;;  %v83_v33 = vperm.slane %v80_v31, 1  ;;  %v428_v44 = vld [vmem:[%s582_s4] ss:$0 sm:$0xff] }
  0x1b   :  { %286 = vmatpush.bf16.msra.mxu3 %v419_v17  ;;  %335 = vmatmul.msk.bf16.vlgmr.msra.gmra.mxu0 %vm106_vm0, %v75_v18  ;;  %v429_v49 = vld [vmem:[%s583_s5] ss:$0 sm:$0xff] }
  0x1c   :  { %336 = vmatmul.msk.bf16.vlgmr.msra.gmra.mxu1 %vm106_vm0, %v75_v18  ;;  %v430_v54 = vld [vmem:[#allocation2] ss:$0 sm:$0xff] }
  0x1e   :  { %274 = vmatpush.bf16.msra.mxu2 %v410_v19 }
  0x1f   :  { %287 = vmatpush.bf16.msra.mxu3 %v418_v20 }
  0x22   :  { %275 = vmatpush.bf16.msra.mxu2 %v409_v21 }
  0x23   :  { %288 = vmatpush.bf16.msra.mxu3 %v417_v22 }
  0x26   :  { %276 = vmatpush.bf16.msra.mxu2 %v408_v23 }
  0x27   :  { %289 = vmatpush.bf16.msra.mxu3 %v416_v24 }
  0x2a   :  { %277 = vmatpush.bf16.msra.mxu2 %v407_v25 }
  0x2b   :  { %290 = vmatpush.bf16.msra.mxu3 %v415_v26 }
  0x2e   :  { %278 = vmatpush.bf16.msra.mxu2 %v406_v27 }
  0x2f   :  { %291 = vmatpush.bf16.msra.mxu3 %v414_v28 }
  0x32   :  { %279 = vmatpush.bf16.msra.mxu2 %v405_v29 }
  0x33   :  { %292 = vmatpush.bf16.msra.mxu3 %v413_v30 }
  0x98   :  { %v119_v34 = vpop.f32.mrf.mxu0 }
  0x99   :  { %v120_v35 = vadd.f32 %v119_v34, %v82_v32  ;;  %v132_v36 = vpop.f32.mrf.mxu1 }
  0x9a   :  { %v133_v37 = vadd.f32 %v132_v36, %v83_v33 }
  0x9b   :  { %v136_v38 = vmax.f32 %v120_v35, 0.0 }
  0x9c   :  { %v137_v39 = vmax.f32 %v133_v37, 0.0 }
  0x9d   :  { %v138_v40 = vpack.c.bf16 %v136_v38, %v136_v38 }
  0x9e   :  { %v139_v41 = vpack.c.bf16 %v137_v39, %v137_v39 }
  0x9f   :  { %280 = vmatmul.bf16.vlgmr.msra.gmra.mxu2 %v138_v40 }
  0xa0   :  { %293 = vmatmul.bf16.vlgmr.msra.gmra.mxu3 %v139_v41  ;;  %v121_v42 = vpop.f32.mrf.mxu0 }
  0xa1   :  { %v134_v43 = vpop.f32.mrf.mxu1 }
 0x122   :  { %v281_v45 = vpop.f32.mrf.mxu2 }
 0x123   :  { %v282_v46 = vadd.f32 %v428_v44, %v281_v45  ;;  %v294_v47 = vpop.f32.mrf.mxu3 }
 0x125   :  { %v295_v48 = vadd.f32 %v294_v47, %v282_v46 }
 0x127   :  { %v298_v50 = vmax.f32 %v295_v48, 0.0 }
 0x129   :  { %v303_v51 = vmul.f32 %v429_v49, %v298_v50 }
 0x12a   :  { %v283_v52 = vpop.f32.mrf.mxu2 }
 0x12b   :  { %v296_v53 = vpop.f32.mrf.mxu3  ;;  %304 = vadd.xlane.f32.xlu0 %v303_v51 }
 0x19e   :  { %v305_v55 = vpop.xlane.xlu0 %304 }
 0x19f   :  { %v310_v56 = vadd.f32 %v430_v54, %v305_v55 }
 0x1a1   :  { %312 = vst.msk [vmem:[%s585_s7] sm:$0xff] %vm311_vm1, %v310_v56 }
 0x1a2   :  { %317 = vsyncpa [#allocation4], 1 }
 0x1a3   :  { %318 = vsyncpa [#allocation6], 1 }

</bundles_post_ra>
